<compile_context>
chip_gen: v7x
topology: tpu7x:2x2x1
jax: 0.10.0
libtpu: 0.0.40
codegen_flags: <defaults>
</compile_context>

<pallas_src>
import jax
import jax.numpy as jnp
from jax.experimental import pallas as pl
from jax.experimental.pallas import tpu as pltpu


def _norm_kernel(scale_ref, bias_ref, x_ref, o_ref):
    # Pure VPU elementwise FMA; per-row scale/bias broadcast across the lane axis.
    # Strictly 1 load + 1 store per element, no in-kernel reshapes or temporaries.
    o_ref[...] = x_ref[...] * scale_ref[...] + bias_ref[...]


def _pick_col_block(num_rows, num_cols, itemsize, max_tile_bytes=2 << 20):
    """Largest multiple-of-128 column block that divides num_cols while keeping a
    (num_rows x block) tile under ~max_tile_bytes. Falls back to the full extent
    when num_cols is not 128-divisible (full-extent blocks are always legal)."""
    if num_cols % 128 != 0:
        return num_cols
    best = 128
    cb = 128
    while cb <= num_cols:
        if num_cols % cb == 0 and num_rows * cb * itemsize <= max_tile_bytes:
            best = cb
        cb += 128
    return best


def normalization(img, mean, std):
    """img: (N, C, H, W); mean, std: (C,). Same math as the PyTorch module:
    (img - mean[:, None, None]) / std[:, None, None]."""
    N, C, H, W = img.shape
    R = N * C
    P = H * W

    # Divide -> multiply: tiny precompute in the wrapper (3 scalars each).
    scale = (1.0 / std).astype(img.dtype)           # (C,)
    bias = (-mean / std).astype(img.dtype)          # (C,)
    # One value per flattened (n, c) row so the kernel is a row-broadcast FMA.
    scale_rows = jnp.tile(scale, N).reshape(R, 1)
    bias_rows = jnp.tile(bias, N).reshape(R, 1)

    # Lane-dense 2-D view of the image (each channel plane is one contiguous row).
    x2d = img.reshape(R, P)

    cb = _pick_col_block(R, P, img.dtype.itemsize)
    n_blocks = P // cb

    grid_spec = pltpu.PrefetchScalarGridSpec(
        num_scalar_prefetch=0,
        grid=(n_blocks,),
        in_specs=[
            pl.BlockSpec((R, 1), lambda j: (0, 0)),    # scale: resident across grid
            pl.BlockSpec((R, 1), lambda j: (0, 0)),    # bias:  resident across grid
            pl.BlockSpec((R, cb), lambda j: (0, j)),   # image column tile
        ],
        out_specs=pl.BlockSpec((R, cb), lambda j: (0, j)),
    )

    out2d = pl.pallas_call(
        _norm_kernel,
        out_shape=jax.ShapeDtypeStruct((R, P), img.dtype),
        grid_spec=grid_spec,
        compiler_params=pltpu.CompilerParams(
            dimension_semantics=("parallel",),
            vmem_limit_bytes=32 << 20,
        ),
    )(scale_rows, bias_rows, x2d)

    return out2d.reshape(N, C, H, W)


if __name__ == "__main__":
    # Deterministic parameters from the module's __init__ (ImageNet stats, C=3).
    mean = jnp.array([0.485, 0.456, 0.406], dtype=jnp.float32)
    std = jnp.array([0.229, 0.224, 0.225], dtype=jnp.float32)

    # Small deterministic input consistent with the forward: NCHW with C=3.
    key = jax.random.PRNGKey(0)
    img = jax.random.uniform(key, (2, 3, 16, 16), dtype=jnp.float32)

    out = normalization(img, mean, std)
    out = jax.block_until_ready(out)

    # Reference check (plain JAX). FMA-vs-divide differs by ~1 ulp; loosen slightly.
    ref = (img - mean[None, :, None, None]) / std[None, :, None, None]
    assert out.shape == ref.shape and out.dtype == ref.dtype
    assert jnp.allclose(out, ref, atol=1e-5, rtol=1e-5)

    print("KERNEL_OK")
</pallas_src>

<mosaic_0001>
module attributes {stable_mosaic.version = 11 : i64} {
  func.func @_norm_kernel(%arg0: i32, %arg1: memref<6x1xf32, #tpu.memory_space<vmem>>, %arg2: memref<6x1xf32, #tpu.memory_space<vmem>>, %arg3: memref<6x256xf32, #tpu.memory_space<vmem>>, %arg4: memref<6x256xf32, #tpu.memory_space<vmem>>) attributes {dimension_semantics = [#tpu.dimension_semantics<parallel>], iteration_bounds = array<i64: 1>, scalar_prefetch = 0 : i64, scratch_operands = 0 : i64, tpu.core_type = #tpu.core_type<tc>, window_params = [{pipeline_mode = #tpu.pipeline_mode<synchronous>, transform_indices = @transform_0, window_bounds = array<i64: 6, 1>}, {pipeline_mode = #tpu.pipeline_mode<synchronous>, transform_indices = @transform_1, window_bounds = array<i64: 6, 1>}, {transform_indices = @transform_2, window_bounds = array<i64: 6, 256>}, {transform_indices = @transform_3, window_bounds = array<i64: 6, 256>}]} {
    %c0 = arith.constant 0 : index
    %c0_0 = arith.constant 0 : index
    %0 = vector.load %arg3[%c0, %c0_0] : memref<6x256xf32, #tpu.memory_space<vmem>>, vector<6x256xf32>
    %c0_1 = arith.constant 0 : index
    %c0_2 = arith.constant 0 : index
    %1 = vector.load %arg1[%c0_1, %c0_2] : memref<6x1xf32, #tpu.memory_space<vmem>>, vector<6x1xf32>
    %2 = vector.broadcast %1 : vector<6x1xf32> to vector<6x256xf32>
    %3 = arith.mulf %0, %2 : vector<6x256xf32>
    %c0_3 = arith.constant 0 : index
    %c0_4 = arith.constant 0 : index
    %4 = vector.load %arg2[%c0_3, %c0_4] : memref<6x1xf32, #tpu.memory_space<vmem>>, vector<6x1xf32>
    %5 = vector.broadcast %4 : vector<6x1xf32> to vector<6x256xf32>
    %6 = arith.addf %3, %5 : vector<6x256xf32>
    %c0_5 = arith.constant 0 : index
    %c0_6 = arith.constant 0 : index
    %7 = vector.load %arg4[%c0_5, %c0_6] : memref<6x256xf32, #tpu.memory_space<vmem>>, vector<6x256xf32>
    tpu.vector_store %arg4[%c0_5, %c0_6], %6 {strides = array<i32>} : memref<6x256xf32, #tpu.memory_space<vmem>>, vector<6x256xf32>,
    return
  }
  func.func @transform_0(%arg0: i32) -> (i32, i32) {
    %c0_i32 = arith.constant 0 : i32
    %c0_i32_0 = arith.constant 0 : i32
    %c0_i32_1 = arith.constant 0 : i32
    return %c0_i32, %c0_i32_0 : i32, i32
  }
  func.func @transform_1(%arg0: i32) -> (i32, i32) {
    %c0_i32 = arith.constant 0 : i32
    %c0_i32_0 = arith.constant 0 : i32
    %c0_i32_1 = arith.constant 0 : i32
    return %c0_i32, %c0_i32_0 : i32, i32
  }
  func.func @transform_2(%arg0: i32) -> (i32, i32) {
    %c0_i32 = arith.constant 0 : i32
    %c0_i32_0 = arith.constant 0 : i32
    return %c0_i32, %arg0 : i32, i32
  }
  func.func @transform_3(%arg0: i32) -> (i32, i32) {
    %c0_i32 = arith.constant 0 : i32
    %c0_i32_0 = arith.constant 0 : i32
    return %c0_i32, %arg0 : i32, i32
  }
}

</mosaic_0001>

<bundles_post_ra>
// kernel: tpu_custom_call.1
= control target key start
LH: loop header
LB: loop body
LE: loop exit
PB: predicated region body
PF: predicated region fallthrough
CT: control target
= control target key end

     0   :  { %v76_v1 = vmov 0   ;;  %s122_s0 = inlined_call_operand.vmem [shape: f32[6,1], index: 0, kind: input, shape index: {}]   ;;  %s123_s1 = inlined_call_operand.vmem [shape: f32[6,1], index: 1, kind: input, shape index: {}]   ;;  %s124_s2 = inlined_call_operand.vmem [shape: f32[6,256], index: 2, kind: input, shape index: {}]   ;;  %s125_s3 = inlined_call_operand.hbm [shape: f32[6,256], index: 3, kind: output, shape index: {}]  }
   0x1   :  { %v17_v0 = vld [vmem:[%s122_s0] sm:$0x3f]  ;;  %51 = vset.pattern.permute.xlu0 %v76_v1 }
   0x2   :  { %8 = vsyncpa [#allocation3], 0  ;;  %20 = vperm.xlu0 %51, %v17_v0   ;;  %v25_v2 = vld [vmem:[%s123_s1] sm:$0x3f]  ;;  %v16_v5 = vld [vmem:[%s124_s2 + $0x8] sm:$0x3f] }
   0x3   :  { %v15_v4 = vld [vmem:[%s124_s2] sm:$0x3f]  ;;  %s77_s20 = smov [#allocation2]  }
   0x4   :  { %s41_s0 = sshll.u32 %s77_s20, 4  ;;  %s42_s0 = int_to_ptr.vmem [resolvable:$true] %s41_s0 }
   0x5   :  { %s52_s1 = scalar_lea.vmem %s42_s0, 256  ;;  %p57_p1 = scmp.lt.s32.totalorder %s42_s0, %s42_s0 }
   0x6   :  { %28 = vperm.xlu0 %51, %v25_v2   ;;  %p53_p0 = scmp.ne.s32.totalorder %s42_s0, %s52_s1  ;;  %p58_p2 = scmp.lt.s32.totalorder %s52_s1, %s52_s1 }
   0x8   :  { %p59_p3 = por %p58_p2, %p57_p1 }
   0xa   :  { %p60_p4 = pnand %p59_p3, %p53_p0 }
  0x81   :  { %v21_v3 = vpop.permute.xlu0 %20 }
  0x82   :  { %v23_v6 = vmul.f32 %v21_v3, %v15_v4  ;;  %v24_v7 = vmul.f32 %v21_v3, %v16_v5 }
  0x85   :  { %v29_v8 = vpop.permute.xlu0 %28 }
  0x86   :  { %v31_v9 = vadd.f32 %v29_v8, %v23_v6  ;;  %v32_v10 = vadd.f32 %v29_v8, %v24_v7 }
  0x88   :  { %33 = vst [vmem:[#allocation2] sm:$0x3f] %v31_v9  ;;  %34 = vst [vmem:[#allocation2 + $0x8] sm:$0x3f] %v32_v10 }
  0x89   :  { %63 = shalt.err (!%p60_p4)
}
  0x8a   :  { %s64_s2 = scalar_lea.hbm %s125_s3, 256 }
  0x8b   :  { %p65_p5 = scmp.ne.s32.totalorder %s125_s3, %s64_s2  ;;  %p68_p6 = scmp.lt.u32.totalorder %s64_s2, %s125_s3 }
  0x8d   :  { %p70_p7 = pnand %p68_p6, %p65_p5 }
  0x8f   :  { %73 = shalt.err (!%p70_p7)
}
  0x90   :  { %44 = dma.vmem_to_hbm [thread:$0]  %s42_s0, 256, %s125_s3, [#allocation3]  }
  0x91   :  { %74 = dma.done.wait [#allocation3], 256  }
  0x92   :  { %75 = vsyncadd [#allocation3], 4294967040 }
  0x93   :  { %48 = vsyncpa [#allocation3], 1 }

</bundles_post_ra>
